<compile_context>
chip_gen: v6e
topology: v6e:2x2x1
jax: 0.10.0
libtpu: 0.0.40
codegen_flags: <defaults>
</compile_context>

<pallas_src>
import jax
import jax.numpy as jnp
from jax.experimental import pallas as pl
from jax.experimental.pallas import tpu as pltpu


def _round_up(x, m):
    return (x + m - 1) // m * m


def _cdiv(a, b):
    return -(-a // b)


def _nll_sum_kernel(x_ref, t_ref, o_ref):
    """x_ref: (TM, TC) log-probs (native dtype); t_ref: (TM, 1) int32 targets with
    ignore_index already folded to -1; o_ref: (TM, 1) f32 per-row partial, resident
    across the class (reduction) grid axis."""
    j = pl.program_id(1)          # class-tile index (reduction axis, innermost)

    @pl.when(j == 0)
    def _init():
        o_ref[...] = jnp.zeros_like(o_ref)

    x = x_ref[...]                # keep native dtype (bf16 stays bf16)
    t = t_ref[...]                # (TM, 1) int32
    tc = x_ref.shape[1]

    # Global class id for every lane of this class tile. Out-of-bounds columns get
    # ids >= C and padded / ignored rows have target -1, so a single compare masks
    # everything (one-hot gather + ignore_index + ragged edges fused).
    class_ids = j * tc + jax.lax.broadcasted_iota(jnp.int32, x.shape, 1)
    hit = class_ids == t

    # Select in the input dtype; widen to f32 inside the lane reduce (at most one
    # hit per row, so the sum is exact), then accumulate into the resident output.
    masked = jnp.where(hit, x, jnp.zeros_like(x))
    o_ref[...] += jnp.sum(masked, axis=1, keepdims=True, dtype=jnp.float32)


def sequence_criterion(inputs, targets, *, row_tile=1024, class_tile=2048):
    """inputs: (..., C) log-probs (any float dtype); targets: (...) int class ids.
    Returns sum_i -inputs[i, targets[i]] skipping targets==0
    (== NLLLoss(ignore_index=0, size_average=False))."""
    C = inputs.shape[-1]
    x = inputs.reshape(-1, C)                   # native dtype; single HBM read, no copy
    t = targets.reshape(-1).astype(jnp.int32)
    N = x.shape[0]

    # Fold ignore_index=0 into the (tiny) targets vector: 0 -> -1 never matches.
    t = jnp.where(t == 0, -1, t)

    # Row tile: multiple of 8, shrunk for small inputs; keep >= 2 row tiles whenever
    # possible so the "parallel" row axis feeds both TensorCores on megacore parts.
    tm = min(row_tile, _round_up(max(N, 8), 8))
    if N > 8 and _cdiv(N, tm) < 2:
        tm = _round_up(_cdiv(N, 2), 8)
    n_row_tiles = _cdiv(N, tm)
    n_pad = n_row_tiles * tm
    if n_pad != N:
        # Only the tiny targets vector is padded; the big x tensor is never padded
        # (ragged last row tile is masked in-kernel via target == -1).
        t = jnp.pad(t, (0, n_pad - N), constant_values=-1)
    t2 = t.reshape(n_pad, 1)

    # Class tile: whole row if it fits, else a 128-aligned tile. No column padding of
    # x -- out-of-bounds columns get class ids >= C which never match a valid target.
    tc = C if C <= class_tile else class_tile
    n_class_tiles = _cdiv(C, tc)

    grid = (n_row_tiles, n_class_tiles)

    # VMEM budget: double-buffered x blocks dominate; add headroom for the small
    # target / output blocks. Capped at 48 MiB so v7x (64 MiB/TC) is never exceeded.
    itemsize = jnp.dtype(x.dtype).itemsize
    vmem_limit = 2 * tm * tc * itemsize + (8 << 20)
    vmem_limit = int(min(max(vmem_limit, 16 << 20), 48 << 20))

    partials = pl.pallas_call(
        _nll_sum_kernel,
        out_shape=jax.ShapeDtypeStruct((n_pad, 1), jnp.float32),
        grid_spec=pltpu.PrefetchScalarGridSpec(
            num_scalar_prefetch=0,
            grid=grid,
            in_specs=[
                pl.BlockSpec((tm, tc), lambda i, j: (i, j)),
                pl.BlockSpec((tm, 1), lambda i, j: (i, 0)),
            ],
            out_specs=pl.BlockSpec((tm, 1), lambda i, j: (i, 0)),
        ),
        compiler_params=pltpu.CompilerParams(
            dimension_semantics=("parallel", "arbitrary"),
            vmem_limit_bytes=vmem_limit,
        ),
    )(x, t2)

    # TODO(synk): fuse log_softmax of raw logits into this kernel (online max /
    # logsumexp across class tiles) to avoid materialising the (N, C) log-prob
    # tensor in HBM at all -- largest end-to-end lever, but it changes the module's
    # input contract (raw logits instead of log-probs), so it is left out here.
    return -jnp.sum(partials)


if __name__ == "__main__":
    key = jax.random.PRNGKey(0)
    k1, k2 = jax.random.split(key)

    B, T, C = 2, 8, 32          # batch=2, seq=8, num_classes=32
    logits = jax.random.normal(k1, (B, T, C), dtype=jnp.float32)
    log_probs = jax.nn.log_softmax(logits, axis=-1)      # NLLLoss expects log-probs
    targets = jax.random.randint(k2, (B, T), 0, C, dtype=jnp.int32)  # includes 0s (ignored)

    loss = sequence_criterion(log_probs, targets)
    loss = jax.block_until_ready(loss)

    # Pure-JAX reference (NLLLoss, ignore_index=0, sum reduction)
    x2 = log_probs.reshape(-1, C)
    t2 = targets.reshape(-1)
    ref = -jnp.sum(jnp.where(t2 != 0, x2[jnp.arange(t2.shape[0]), t2], 0.0))
    assert jnp.allclose(loss, ref, rtol=1e-5, atol=1e-5), (loss, ref)

    print("KERNEL_OK")
</pallas_src>

<mosaic_0001>
module attributes {stable_mosaic.version = 11 : i64} {
  func.func @_nll_sum_kernel(%arg0: i32, %arg1: i32, %arg2: memref<8x32xf32, #tpu.memory_space<vmem>>, %arg3: memref<8x1xi32, #tpu.memory_space<vmem>>, %arg4: memref<8x1xf32, #tpu.memory_space<vmem>>) attributes {dimension_semantics = [#tpu.dimension_semantics<parallel>, #tpu.dimension_semantics<arbitrary>], iteration_bounds = array<i64: 2, 1>, scalar_prefetch = 0 : i64, scratch_operands = 0 : i64, tpu.core_type = #tpu.core_type<tc>, window_params = [{transform_indices = @transform_0, window_bounds = array<i64: 8, 32>}, {transform_indices = @transform_1, window_bounds = array<i64: 8, 1>}, {transform_indices = @transform_2, window_bounds = array<i64: 8, 1>}]} {
    %c0_i32 = arith.constant 0 : i32
    %0 = arith.cmpi eq, %arg1, %c0_i32 : i32
    %1 = arith.extui %0 : i1 to i32
    %c0_i32_0 = arith.constant 0 : i32
    %2 = arith.cmpi ne, %1, %c0_i32_0 : i32
    scf.if %2 {
      %cst_9 = arith.constant 0.000000e+00 : f32
      %18 = vector.broadcast %cst_9 : f32 to vector<8x1xf32>
      %c0_10 = arith.constant 0 : index
      %c0_11 = arith.constant 0 : index
      %19 = vector.load %arg4[%c0_10, %c0_11] : memref<8x1xf32, #tpu.memory_space<vmem>>, vector<8x1xf32>
      tpu.vector_store %arg4[%c0_10, %c0_11], %18 {strides = array<i32>} : memref<8x1xf32, #tpu.memory_space<vmem>>, vector<8x1xf32>,
    } else {
    }
    %c0 = arith.constant 0 : index
    %c0_1 = arith.constant 0 : index
    %3 = vector.load %arg2[%c0, %c0_1] : memref<8x32xf32, #tpu.memory_space<vmem>>, vector<8x32xf32>
    %c0_2 = arith.constant 0 : index
    %c0_3 = arith.constant 0 : index
    %4 = vector.load %arg3[%c0_2, %c0_3] : memref<8x1xi32, #tpu.memory_space<vmem>>, vector<8x1xi32>
    %c32_i32 = arith.constant 32 : i32
    %5 = arith.muli %arg1, %c32_i32 : i32
    %6 = tpu.iota {dimensions = array<i32: 1>} : vector<8x32xi32>
    %7 = vector.broadcast %5 : i32 to vector<8x32xi32>
    %8 = arith.addi %7, %6 : vector<8x32xi32>
    %9 = vector.broadcast %4 : vector<8x1xi32> to vector<8x32xi32>
    %10 = arith.cmpi eq, %8, %9 : vector<8x32xi32>
    %cst = arith.constant 0.000000e+00 : f32
    %11 = vector.broadcast %cst : f32 to vector<8x32xf32>
    %12 = arith.select %10, %3, %11 : vector<8x32xi1>, vector<8x32xf32>
    %c0_4 = arith.constant 0 : index
    %c0_5 = arith.constant 0 : index
    %13 = vector.load %arg4[%c0_4, %c0_5] : memref<8x1xf32, #tpu.memory_space<vmem>>, vector<8x1xf32>
    %cst_6 = arith.constant dense<0.000000e+00> : vector<8xf32>
    %14 = vector.multi_reduction <add>, %12, %cst_6 [1] : vector<8x32xf32> to vector<8xf32>
    %15 = vector.shape_cast %14 : vector<8xf32> to vector<8x1xf32>
    %16 = arith.addf %13, %15 : vector<8x1xf32>
    %c0_7 = arith.constant 0 : index
    %c0_8 = arith.constant 0 : index
    %17 = vector.load %arg4[%c0_7, %c0_8] : memref<8x1xf32, #tpu.memory_space<vmem>>, vector<8x1xf32>
    tpu.vector_store %arg4[%c0_7, %c0_8], %16 {strides = array<i32>} : memref<8x1xf32, #tpu.memory_space<vmem>>, vector<8x1xf32>,
    return
  }
  func.func @transform_0(%arg0: i32, %arg1: i32) -> (i32, i32) {
    %c0_i32 = arith.constant 0 : i32
    return %arg0, %arg1 : i32, i32
  }
  func.func @transform_1(%arg0: i32, %arg1: i32) -> (i32, i32) {
    %c0_i32 = arith.constant 0 : i32
    %c0_i32_0 = arith.constant 0 : i32
    return %arg0, %c0_i32 : i32, i32
  }
  func.func @transform_2(%arg0: i32, %arg1: i32) -> (i32, i32) {
    %c0_i32 = arith.constant 0 : i32
    %c0_i32_0 = arith.constant 0 : i32
    return %arg0, %c0_i32 : i32, i32
  }
}

</mosaic_0001>

<bundles_post_ra>
// kernel: tpu_custom_call.1
= control target key start
LH: loop header
LB: loop body
LE: loop exit
PB: predicated region body
PF: predicated region fallthrough
CT: control target
= control target key end

     0   :  { %s359_s9 = smov 0   ;;  %s361_s10 = smov 0   ;;  %s397_s0 = inlined_call_operand.vmem [shape: f32[16,32], index: 0, kind: input, shape index: {}]   ;;  %s398_s1 = inlined_call_operand.vmem [shape: s32[16,1], index: 1, kind: input, shape index: {}]   ;;  %s399_s2 = inlined_call_operand.vmem [shape: f32[16,1], index: 2, kind: output, shape index: {}]  }
   0x1   :  { %s363_s11 = smov 0  }
   0x2 LB: > { %s24_s12 = sadd.s32 1, %s336_s10  ;;  %p285_p0 = scmp.ge.s32.totalorder %s340_s11, 1  ;;  %s340_s11 = sphi %s363_s11, %s12_s11   ;;  %s336_s10 = sphi %s361_s10, %s401_s10   ;;  %s332_s9 = sphi %s359_s9, %s400_s9  }
   0x3   : > { %p26_p1 = scmp.ge.s32.totalorder %s24_s12, 2  ;;  %p137_p2 = scmp.lt.s32.totalorder %s340_s11, 3 }
   0x5   : > { %s403_s12 = smov (%p26_p1, %s24_s12), 0  ;;  %p138_p3 = pnand %p285_p0, %p137_p2 }
   0x6   : > { %p164_p4 = scmp.lt.s32.totalorder (!%p138_p3), %s332_s9, 1 }
   0x7   : > { %141 = sbr.rel (%p138_p3) target bundleno = 284 (0x11c), region = 28 }
   0xc   : > { %v342_v0 = vmov 0   ;;  %s405_s9 = smov (!%p164_p4, %s332_s9), 1  ;;  %vm183_vm0 = vcmask 7168   ;;  %v343_v2 = vmov 0.0   ;;  %v188_v3 = vlaneseq }
   0xd   : > { %317 = vset.pattern.permute.xlu0 %v342_v0  ;;  %s286_s13 = sshll.u32 %s405_s9, 3  ;;  %vm198_vm1 = vcmask 261120  }
   0xe   : > { %s174_s16 = scalar_lea.vmem %s398_s1, %s286_s13  ;;  %s178_s19 = scalar_lea.vmem %s399_s2, %s286_s13  ;;  %v189_v4 = vand.u32 127, %v188_v3 }
   0xf   : > { %v186_v1 = vld [vmem:[%s174_s16] sm:$0xff]  ;;  %184 = vst.msk [vmem:[%s178_s19] sm:$0xff] %vm183_vm0, %v343_v2  ;;  %s170_s22 = scalar_lea.vmem %s397_s0, %s286_s13 }
  0x10   : > { %193 = vperm.xlu0 %317, %v186_v1   ;;  %v185_v5 = vld [vmem:[%s170_s22] sm:$0xff] }
  0x16   : > { %v197_v9 = vld [vmem:[%s178_s19] sm:$0xff] }
  0x8b   : > { %v194_v6 = vpop.permute.xlu0 %193 }
  0x8c   : > { %vm195_vm2 = vcmp.eq.s32.totalorder %v189_v4, %v194_v6 }
  0x8d   : > { %v196_v7 = vsel %vm195_vm2, %v185_v5, 0.0 }
  0x8e   : > { %v199_v8 = vsel %vm198_vm1, %v196_v7, 0.0 }
  0x8f   : > { %200 = vadd.xlane.f32.xlu0 %v199_v8 }
 0x118   : > { %v201_v10 = vpop.xlane.xlu0 %200 }
 0x119   : > { %v202_v11 = vadd.f32 %v201_v10, %v197_v9 }
 0x11b   : > { %204 = vst.msk [vmem:[%s178_s19] sm:$0xff] %vm183_vm0, %v202_v11 }
 0x11c PF: > { %s12_s11 = sadd.s32 1, %s340_s11   ;;  %s400_s9 = smov %s336_s10 }
 0x11d   : > { %p9_p5 = scmp.ge.s32.totalorder %s12_s11, 4   ;;  %s401_s10 = smov %s403_s12 }
 0x11f   :  { %11 = sbr.rel (!%p9_p5) target bundleno = 2 (0x2), region = 65 }

</bundles_post_ra>
